<compile_context>
chip_gen: v5e
topology: v5e:2x2
jax: 0.10.0
libtpu: 0.0.40
codegen_flags: <defaults>
</compile_context>

<pallas_src>
import math
from typing import List, NamedTuple, Optional, Tuple

import jax
import jax.numpy as jnp
from jax.experimental import pallas as pl
from jax.experimental.pallas import tpu as pltpu

LANE = 128  # TPU lane width (last-dim alignment target on v5e/v6e/v7x)

# Constant-index parameters never change across grid steps -> single buffer.
_CONST_PIPELINE = (
    {"pipeline_mode": pl.Buffered(1)} if hasattr(pl, "Buffered") else {}
)


def _round_up(x: int, m: int) -> int:
    return ((x + m - 1) // m) * m


def _cdiv(a: int, b: int) -> int:
    return -(-a // b)


def _choose_tile_m(batch: int, sublane: int, cap: int = 512) -> int:
    """Batch tile: sublane-aligned, capped at `cap`, >=2 grid steps whenever
    the batch spans more than one sublane tile (feeds both v7x TCs), and with
    minimal B_pad overshoot."""
    b_sub = _round_up(batch, sublane)
    if b_sub <= sublane:
        return sublane
    n_tiles = max(2, _cdiv(b_sub, cap))
    return _round_up(_cdiv(b_sub, n_tiles), sublane)


# ----------------------------------------------------------------------------
# One-time parameter preparation (padding hoisted out of the forward path).
# ----------------------------------------------------------------------------
class DecoderParams(NamedTuple):
    weights: Tuple[jax.Array, ...]      # layer l: (in_l or in_l_padded, out_l_padded)
    biases: Tuple[jax.Array, ...]       # layer l: (1, out_l_padded)
    dims: Tuple[int, ...]               # true dims: [latent, h1, ..., input_dim]
    dims_padded: Tuple[int, ...]        # padded dims used inside the kernel


def prepare_decoder_params(weights: List[jax.Array], biases: List[jax.Array],
                           *, lane: int = LANE) -> DecoderParams:
    """weights[l]: (in_l, out_l) (already transposed vs. PyTorch), biases[l]: (out_l,).
    Pads feature dims (except the first layer's input dim) to lane multiples ONCE."""
    dims = [int(weights[0].shape[0])] + [int(w.shape[1]) for w in weights]
    # First input dim stays unpadded: x is fed at its true width (no HBM pad of x).
    dims_p = [dims[0]] + [_round_up(d, lane) for d in dims[1:]]

    w_pad, b_pad = [], []
    for l, (w, b) in enumerate(zip(weights, biases)):
        in_p = dims[0] if l == 0 else dims_p[l]
        out_p = dims_p[l + 1]
        w_p = (jnp.zeros((in_p, out_p), w.dtype)
               .at[: dims[l], : dims[l + 1]].set(w))
        b_p = (jnp.zeros((1, out_p), b.dtype)
               .at[:, : dims[l + 1]].set(jnp.reshape(b, (1, -1))))
        w_pad.append(w_p)
        b_pad.append(b_p)
    return DecoderParams(tuple(w_pad), tuple(b_pad), tuple(dims), tuple(dims_p))


# ----------------------------------------------------------------------------
# Kernel: fused multi-layer (Linear + Sigmoid) MLP over one batch tile.
# ----------------------------------------------------------------------------
def _make_decoder_kernel(num_layers: int):
    def kernel(x_ref, *refs):
        # refs layout: w0, b0, w1, b1, ..., w_{L-1}, b_{L-1}, out_ref
        w_refs = refs[0: 2 * num_layers: 2]
        b_refs = refs[1: 2 * num_layers: 2]
        out_ref = refs[2 * num_layers]

        h = x_ref[...]  # native dtype, no upcast; MXU accumulates in f32 below
        for w_ref, b_ref in zip(w_refs, b_refs):
            act = jnp.dot(h, w_ref[...], preferred_element_type=jnp.float32)
            act = act + b_ref[...]                 # (1, N) bias broadcast
            # sigmoid(x) == 0.5*tanh(0.5*x)+0.5 : transcendental on the EUP,
            # no f32 divide sequence on the VALU.
            act = 0.5 * jnp.tanh(0.5 * act) + 0.5
            h = act.astype(w_ref.dtype)            # keep next matmul native dtype
        out_ref[...] = h.astype(out_ref.dtype)

    return kernel


# ----------------------------------------------------------------------------
# Forward wrapper.
# ----------------------------------------------------------------------------
def decoder_forward(x: jax.Array, params: DecoderParams,
                    *, tile_m: Optional[int] = None) -> jax.Array:
    """x: [B, latent_dim]. Returns [B, input_dim]."""
    B, latent = x.shape
    assert latent == params.dims[0], "latent dim mismatch"
    num_layers = len(params.weights)
    out_dim = params.dims[-1]
    out_dim_p = params.dims_padded[-1]

    sub = 16 if x.dtype == jnp.bfloat16 else 8     # rows per packed vreg
    if tile_m is None:
        tile_m = _choose_tile_m(B, sub)
    else:
        tile_m = _round_up(tile_m, sub)
    B_pad = _round_up(B, tile_m)

    # Only batch padding (no feature-dim pad of x in HBM); skip entirely when aligned.
    x_p = x if B_pad == B else jnp.zeros((B_pad, latent), x.dtype).at[:B].set(x)

    in_specs = [pl.BlockSpec((tile_m, latent), lambda i: (i, 0))]
    flat_params = []
    for w, b in zip(params.weights, params.biases):
        flat_params.extend([w, b])
        # Full weight/bias resident in VMEM; constant block index across the grid,
        # single-buffered (never re-fetched).
        in_specs.append(pl.BlockSpec(tuple(w.shape), lambda i: (0, 0), **_CONST_PIPELINE))
        in_specs.append(pl.BlockSpec(tuple(b.shape), lambda i: (0, 0), **_CONST_PIPELINE))
    out_spec = pl.BlockSpec((tile_m, out_dim_p), lambda i: (i, 0))

    # Rough VMEM footprint: params (single or double buffered) + double-buffered
    # x/out tiles + f32 activation headroom.  Only raise the limit when needed.
    param_buf = 1 if _CONST_PIPELINE else 2
    param_bytes = sum(math.prod(a.shape) * a.dtype.itemsize for a in flat_params)
    io_bytes = 2 * tile_m * (latent + out_dim_p) * x.dtype.itemsize
    act_bytes = 3 * 4 * tile_m * max(params.dims_padded)
    est_bytes = param_buf * param_bytes + io_bytes + act_bytes
    vmem_limit = None
    if est_bytes > 32 * 1024 * 1024:
        vmem_limit = min(int(est_bytes * 1.25), 128 * 1024 * 1024)

    out_padded = pl.pallas_call(
        _make_decoder_kernel(num_layers),
        out_shape=jax.ShapeDtypeStruct((B_pad, out_dim_p), x.dtype),
        grid_spec=pltpu.PrefetchScalarGridSpec(
            num_scalar_prefetch=0,
            grid=(B_pad // tile_m,),
            in_specs=in_specs,
            out_specs=out_spec,
        ),
        compiler_params=pltpu.CompilerParams(
            dimension_semantics=("parallel",),
            vmem_limit_bytes=vmem_limit,
        ),
    )(x_p, *flat_params)

    return out_padded[:B, :out_dim]


# ----------------------------------------------------------------------------
# Deterministic parameter initialization (PyTorch-style uniform bounds).
# ----------------------------------------------------------------------------
def init_decoder_params(key, input_dim: int, hidden_dims: List[int], latent_dim: int):
    architecture = [latent_dim] + hidden_dims + [input_dim]
    weights, biases = [], []
    for in_dim, out_dim in zip(architecture[:-1], architecture[1:]):
        key, wk, bk = jax.random.split(key, 3)
        bound = float(in_dim) ** -0.5
        # Stored as (in_dim, out_dim) == W.T of the PyTorch (out, in) weight.
        w = jax.random.uniform(wk, (in_dim, out_dim), jnp.float32, -bound, bound)
        b = jax.random.uniform(bk, (out_dim,), jnp.float32, -bound, bound)
        weights.append(w)
        biases.append(b)
    return weights, biases


# Pure-JAX reference for correctness checking.
def decoder_reference(x, weights, biases):
    h = x
    for w, b in zip(weights, biases):
        h = jax.nn.sigmoid(h @ w + b)
    return h


if __name__ == "__main__":
    # Small shapes consistent with the module's forward:
    # batch=16, latent_dim=16, hidden_dims=[32, 32], input_dim=24
    batch = 16
    latent_dim = 16
    hidden_dims = [32, 32]
    input_dim = 24

    key = jax.random.PRNGKey(0)
    key, xk = jax.random.split(key)
    x = jax.random.normal(xk, (batch, latent_dim), jnp.float32)

    weights, biases = init_decoder_params(key, input_dim, hidden_dims, latent_dim)

    # One-time padding / layout prep (hoisted out of the per-call path).
    params = prepare_decoder_params(weights, biases)
    params = jax.tree_util.tree_map(
        lambda a: jax.block_until_ready(a) if isinstance(a, jax.Array) else a, params)

    out = decoder_forward(x, params)
    out = jax.block_until_ready(out)

    ref = decoder_reference(x, weights, biases)
    assert out.shape == (batch, input_dim)
    assert jnp.allclose(out, ref, atol=1e-5, rtol=1e-5), "mismatch vs reference"

    # Batch that is NOT a multiple of the sublane/tile size (handled by padding).
    x2 = jax.random.normal(jax.random.PRNGKey(1), (10, latent_dim), jnp.float32)
    out2 = jax.block_until_ready(decoder_forward(x2, params))
    ref2 = decoder_reference(x2, weights, biases)
    assert out2.shape == (10, input_dim)
    assert jnp.allclose(out2, ref2, atol=1e-5, rtol=1e-5), "mismatch vs reference (ragged batch)"

    # Larger batch exercising the multi-step grid / bigger tiles path.
    x3 = jax.random.normal(jax.random.PRNGKey(2), (260, latent_dim), jnp.float32)
    out3 = jax.block_until_ready(decoder_forward(x3, params))
    ref3 = decoder_reference(x3, weights, biases)
    assert out3.shape == (260, input_dim)
    assert jnp.allclose(out3, ref3, atol=1e-5, rtol=1e-5), "mismatch vs reference (large batch)"

    print("KERNEL_OK")
</pallas_src>

<mosaic_0001>
module attributes {stable_mosaic.version = 11 : i64} {
  func.func @kernel(%arg0: i32, %arg1: memref<8x16xf32, #tpu.memory_space<vmem>>, %arg2: memref<16x128xf32, #tpu.memory_space<vmem>>, %arg3: memref<1x128xf32, #tpu.memory_space<vmem>>, %arg4: memref<128x128xf32, #tpu.memory_space<vmem>>, %arg5: memref<1x128xf32, #tpu.memory_space<vmem>>, %arg6: memref<128x128xf32, #tpu.memory_space<vmem>>, %arg7: memref<1x128xf32, #tpu.memory_space<vmem>>, %arg8: memref<8x128xf32, #tpu.memory_space<vmem>>) attributes {dimension_semantics = [#tpu.dimension_semantics<parallel>], iteration_bounds = array<i64: 2>, scalar_prefetch = 0 : i64, scratch_operands = 0 : i64, tpu.core_type = #tpu.core_type<tc>, window_params = [{transform_indices = @transform_0, window_bounds = array<i64: 8, 16>}, {pipeline_mode = #tpu.pipeline_mode<synchronous>, transform_indices = @transform_1, window_bounds = array<i64: 16, 128>}, {pipeline_mode = #tpu.pipeline_mode<synchronous>, transform_indices = @transform_2, window_bounds = array<i64: 1, 128>}, {pipeline_mode = #tpu.pipeline_mode<synchronous>, transform_indices = @transform_3, window_bounds = array<i64: 128, 128>}, {pipeline_mode = #tpu.pipeline_mode<synchronous>, transform_indices = @transform_4, window_bounds = array<i64: 1, 128>}, {pipeline_mode = #tpu.pipeline_mode<synchronous>, transform_indices = @transform_5, window_bounds = array<i64: 128, 128>}, {pipeline_mode = #tpu.pipeline_mode<synchronous>, transform_indices = @transform_6, window_bounds = array<i64: 1, 128>}, {transform_indices = @transform_7, window_bounds = array<i64: 8, 128>}]} {
    %c0 = arith.constant 0 : index
    %c0_0 = arith.constant 0 : index
    %0 = vector.load %arg1[%c0, %c0_0] : memref<8x16xf32, #tpu.memory_space<vmem>>, vector<8x16xf32>
    %c0_1 = arith.constant 0 : index
    %c0_2 = arith.constant 0 : index
    %1 = vector.load %arg2[%c0_1, %c0_2] : memref<16x128xf32, #tpu.memory_space<vmem>>, vector<16x128xf32>
    %cst = arith.constant dense<0.000000e+00> : vector<8x128xf32>
    %2 = tpu.matmul %0, %1, %cst {dimension_numbers = #tpu.dot_dimension_numbers<[1], [0], [0], [1], [0, 0, 1, 1], [], []>} : vector<8x16xf32>, vector<16x128xf32>, vector<8x128xf32> -> vector<8x128xf32>
    %c0_3 = arith.constant 0 : index
    %c0_4 = arith.constant 0 : index
    %3 = vector.load %arg3[%c0_3, %c0_4] : memref<1x128xf32, #tpu.memory_space<vmem>>, vector<1x128xf32>
    %4 = vector.broadcast %3 : vector<1x128xf32> to vector<8x128xf32>
    %5 = arith.addf %2, %4 : vector<8x128xf32>
    %cst_5 = arith.constant 5.000000e-01 : f32
    %6 = vector.broadcast %cst_5 : f32 to vector<8x128xf32>
    %7 = arith.mulf %6, %5 : vector<8x128xf32>
    %8 = math.tanh %7 : vector<8x128xf32>
    %cst_6 = arith.constant 5.000000e-01 : f32
    %9 = vector.broadcast %cst_6 : f32 to vector<8x128xf32>
    %10 = arith.mulf %9, %8 : vector<8x128xf32>
    %cst_7 = arith.constant 5.000000e-01 : f32
    %11 = vector.broadcast %cst_7 : f32 to vector<8x128xf32>
    %12 = arith.addf %10, %11 : vector<8x128xf32>
    %c0_8 = arith.constant 0 : index
    %c0_9 = arith.constant 0 : index
    %13 = vector.load %arg4[%c0_8, %c0_9] : memref<128x128xf32, #tpu.memory_space<vmem>>, vector<128x128xf32>
    %cst_10 = arith.constant dense<0.000000e+00> : vector<8x128xf32>
    %14 = tpu.matmul %12, %13, %cst_10 {dimension_numbers = #tpu.dot_dimension_numbers<[1], [0], [0], [1], [0, 0, 1, 1], [], []>} : vector<8x128xf32>, vector<128x128xf32>, vector<8x128xf32> -> vector<8x128xf32>
    %c0_11 = arith.constant 0 : index
    %c0_12 = arith.constant 0 : index
    %15 = vector.load %arg5[%c0_11, %c0_12] : memref<1x128xf32, #tpu.memory_space<vmem>>, vector<1x128xf32>
    %16 = vector.broadcast %15 : vector<1x128xf32> to vector<8x128xf32>
    %17 = arith.addf %14, %16 : vector<8x128xf32>
    %cst_13 = arith.constant 5.000000e-01 : f32
    %18 = vector.broadcast %cst_13 : f32 to vector<8x128xf32>
    %19 = arith.mulf %18, %17 : vector<8x128xf32>
    %20 = math.tanh %19 : vector<8x128xf32>
    %cst_14 = arith.constant 5.000000e-01 : f32
    %21 = vector.broadcast %cst_14 : f32 to vector<8x128xf32>
    %22 = arith.mulf %21, %20 : vector<8x128xf32>
    %cst_15 = arith.constant 5.000000e-01 : f32
    %23 = vector.broadcast %cst_15 : f32 to vector<8x128xf32>
    %24 = arith.addf %22, %23 : vector<8x128xf32>
    %c0_16 = arith.constant 0 : index
    %c0_17 = arith.constant 0 : index
    %25 = vector.load %arg6[%c0_16, %c0_17] : memref<128x128xf32, #tpu.memory_space<vmem>>, vector<128x128xf32>
    %cst_18 = arith.constant dense<0.000000e+00> : vector<8x128xf32>
    %26 = tpu.matmul %24, %25, %cst_18 {dimension_numbers = #tpu.dot_dimension_numbers<[1], [0], [0], [1], [0, 0, 1, 1], [], []>} : vector<8x128xf32>, vector<128x128xf32>, vector<8x128xf32> -> vector<8x128xf32>
    %c0_19 = arith.constant 0 : index
    %c0_20 = arith.constant 0 : index
    %27 = vector.load %arg7[%c0_19, %c0_20] : memref<1x128xf32, #tpu.memory_space<vmem>>, vector<1x128xf32>
    %28 = vector.broadcast %27 : vector<1x128xf32> to vector<8x128xf32>
    %29 = arith.addf %26, %28 : vector<8x128xf32>
    %cst_21 = arith.constant 5.000000e-01 : f32
    %30 = vector.broadcast %cst_21 : f32 to vector<8x128xf32>
    %31 = arith.mulf %30, %29 : vector<8x128xf32>
    %32 = math.tanh %31 : vector<8x128xf32>
    %cst_22 = arith.constant 5.000000e-01 : f32
    %33 = vector.broadcast %cst_22 : f32 to vector<8x128xf32>
    %34 = arith.mulf %33, %32 : vector<8x128xf32>
    %cst_23 = arith.constant 5.000000e-01 : f32
    %35 = vector.broadcast %cst_23 : f32 to vector<8x128xf32>
    %36 = arith.addf %34, %35 : vector<8x128xf32>
    %c0_24 = arith.constant 0 : index
    %c0_25 = arith.constant 0 : index
    %37 = vector.load %arg8[%c0_24, %c0_25] : memref<8x128xf32, #tpu.memory_space<vmem>>, vector<8x128xf32>
    tpu.vector_store %arg8[%c0_24, %c0_25], %36 {strides = array<i32>} : memref<8x128xf32, #tpu.memory_space<vmem>>, vector<8x128xf32>,
    return
  }
  func.func @transform_0(%arg0: i32) -> (i32, i32) {
    %c0_i32 = arith.constant 0 : i32
    %c0_i32_0 = arith.constant 0 : i32
    return %arg0, %c0_i32 : i32, i32
  }
  func.func @transform_1(%arg0: i32) -> (i32, i32) {
    %c0_i32 = arith.constant 0 : i32
    %c0_i32_0 = arith.constant 0 : i32
    %c0_i32_1 = arith.constant 0 : i32
    return %c0_i32, %c0_i32_0 : i32, i32
  }
  func.func @transform_2(%arg0: i32) -> (i32, i32) {
    %c0_i32 = arith.constant 0 : i32
    %c0_i32_0 = arith.constant 0 : i32
    %c0_i32_1 = arith.constant 0 : i32
    return %c0_i32, %c0_i32_0 : i32, i32
  }
  func.func @transform_3(%arg0: i32) -> (i32, i32) {
    %c0_i32 = arith.constant 0 : i32
    %c0_i32_0 = arith.constant 0 : i32
    %c0_i32_1 = arith.constant 0 : i32
    return %c0_i32, %c0_i32_0 : i32, i32
  }
  func.func @transform_4(%arg0: i32) -> (i32, i32) {
    %c0_i32 = arith.constant 0 : i32
    %c0_i32_0 = arith.constant 0 : i32
    %c0_i32_1 = arith.constant 0 : i32
    return %c0_i32, %c0_i32_0 : i32, i32
  }
  func.func @transform_5(%arg0: i32) -> (i32, i32) {
    %c0_i32 = arith.constant 0 : i32
    %c0_i32_0 = arith.constant 0 : i32
    %c0_i32_1 = arith.constant 0 : i32
    return %c0_i32, %c0_i32_0 : i32, i32
  }
  func.func @transform_6(%arg0: i32) -> (i32, i32) {
    %c0_i32 = arith.constant 0 : i32
    %c0_i32_0 = arith.constant 0 : i32
    %c0_i32_1 = arith.constant 0 : i32
    return %c0_i32, %c0_i32_0 : i32, i32
  }
  func.func @transform_7(%arg0: i32) -> (i32, i32) {
    %c0_i32 = arith.constant 0 : i32
    %c0_i32_0 = arith.constant 0 : i32
    return %arg0, %c0_i32 : i32, i32
  }
}

</mosaic_0001>

<bundles_post_ra>
// kernel: tpu_custom_call.1
= control target key start
LH: loop header
LB: loop body
LE: loop exit
PB: predicated region body
PF: predicated region fallthrough
CT: control target
= control target key end

     0   :  { %s1102_s0 = inlined_call_operand.hbm [shape: f32[16,16], index: 0, kind: input, shape index: {}]   ;;  %s1103_s1 = inlined_call_operand.hbm [shape: f32[16,128], index: 1, kind: input, shape index: {}]   ;;  %s1104_s2 = inlined_call_operand.vmem [shape: f32[1,128], index: 2, kind: input, shape index: {}]   ;;  %s1105_s3 = inlined_call_operand.hbm [shape: f32[128,128], index: 3, kind: input, shape index: {}]   ;;  %s1106_s4 = inlined_call_operand.vmem [shape: f32[1,128], index: 4, kind: input, shape index: {}]   ;;  %s1107_s5 = inlined_call_operand.hbm [shape: f32[128,128], index: 5, kind: input, shape index: {}]   ;;  %s1108_s6 = inlined_call_operand.vmem [shape: f32[1,128], index: 6, kind: input, shape index: {}]   ;;  %s1109_s7 = inlined_call_operand.hbm [shape: f32[16,128], index: 7, kind: output, shape index: {}]  }
   0x1   :  { %1110 = sst [smem:[#allocation15_spill]] %s1103_s1 }
   0x2   :  { %12 = vsyncpa [#allocation3], 0 }
   0x3   :  { %14 = vsyncpa [#allocation3 + $0x1], 0 }
   0x4   :  { %15 = vsyncpa [#allocation6], 0 }
   0x5   :  { %16 = vsyncpa [#allocation9], 0 }
   0x6   :  { %17 = vsyncpa [#allocation4], 0 }
   0x7   :  { %19 = vsyncpa [#allocation4 + $0x1], 0  ;;  %s933_s24 = smov 0   ;;  %s935_s25 = smov 0  }
   0x8   :  { %s937_s26 = smov 0   ;;  %s939_s27 = smov 0  }
   0x9 LB: > { %s1111_s1 = sld [smem:[#allocation15_spill]]  ;;  %s957_s8 = sadd.s32 4294967295, %s886_s27   ;;  %s886_s27 = sphi %s939_s27, %s1122_s27   ;;  %s882_s26 = sphi %s937_s26, %s1121_s26   ;;  %s878_s25 = sphi %s935_s25, %s1120_s25   ;;  %s874_s24 = sphi %s933_s24, %s1119_s24  }
   0xa   : > { %p586_p0 = scmp.ge.s32.totalorder %s886_s27, 1  ;;  %p46_p1 = scmp.eq.s32.totalorder %s957_s8, 0 }
   0xb   : > { %p208_p2 = scmp.lt.s32.totalorder %s886_s27, 3  ;;  %s888_s10 = smov [#allocation5]  }
   0xc   : > { %s221_s11 = sshll.u32 %s888_s10, 4  ;;  %s236_s14 = sshll.u32 %s1105_s3, 4  ;;  %s222_s11 = int_to_ptr.vmem [resolvable:$true] %s221_s11  ;;  %s237_s14 = int_to_ptr.hbm [resolvable:$true] %s236_s14 }
   0xd   : > { %p962_p3 = pnand %p586_p0, %p208_p2  ;;  %s253_s18 = sshll.u32 %s1107_s5, 4  ;;  %s254_s18 = int_to_ptr.hbm [resolvable:$true] %s253_s18 }
   0xe   : > { %s889_s19 = smov [#allocation7]   ;;  %s890_s21 = smov 128  }
   0xf   : > { %s219_s30 = sshll.u32 %s1111_s1, 4  ;;  %p620_p4 = pneg %p962_p3  ;;  %s220_s30 = int_to_ptr.hbm [resolvable:$true] %s219_s30 }
  0x10   : > { %s238_s20 = sshll.u32 %s889_s19, 4  ;;  %s891_s22 = smov 8   ;;  %s239_s20 = int_to_ptr.vmem [resolvable:$true] %s238_s20 }
  0x11   : > { %p974_p6 = pnand %p620_p4, %p46_p1  ;;  %s892_s23 = smov [#allocation8]  }
  0x12   : > { %s255_s28 = sshll.u32 %s892_s23, 4  ;;  %s585_s29 = sadd.s32 4294967294, %s886_s27   ;;  %s256_s28 = int_to_ptr.vmem [resolvable:$true] %s255_s28 }
  0x13   : > { %623 = dma.hbm_to_vmem [thread:$0]  (!%p974_p6), %s220_s30, 256, %s222_s11, [#allocation6], %s890_s21, %s890_s21, %s891_s22  }
  0x14   : > { %626 = dma.hbm_to_vmem [thread:$0]  (!%p974_p6), %s237_s14, 2048, %s239_s20, [#allocation6], %s890_s21, %s890_s21, %s891_s22  }
  0x15   : > { %629 = dma.hbm_to_vmem [thread:$0]  (!%p974_p6), %s254_s18, 2048, %s256_s28, [#allocation9], %s890_s21, %s890_s21, %s891_s22  }
  0x16   : > { %s989_s10 = sadd.s32 1, %s886_s27   ;;  %s32_s12 = sadd.s32 1, %s882_s26 }
  0x17   : > { %s29_s30 = ssub.s32 %s886_s27, %s989_s10  ;;  %p39_p7 = scmp.ne.s32.totalorder %s882_s26, %s878_s25 }
  0x18   : > { %p30_p8 = scmp.eq.s32.totalorder %s29_s30, 0  ;;  %p40_p9 = scmp.eq.s32.totalorder %s886_s27, 0 }
  0x19   : > { %p45_p10 = scmp.ne.s32.totalorder %s878_s25, %s874_s24  ;;  %p195_p11 = scmp.eq.s32.totalorder %s957_s8, 1 }
  0x1a   : > { %s1001_s11 = scalar_select %p30_p8, %s882_s26, %s32_s12  }
  0x1b   : > { %p1005_p12 = por %p46_p1, %p45_p10  ;;  %p1009_p13 = por %p195_p11, %p39_p7 }
  0x1c   : > { %p201_p0 = scmp.eq.s32.totalorder %s585_s29, 1  ;;  %p41_p2 = por %p40_p9, %p39_p7 }
  0x1d   : > { %s272_s15 = sand.u32 1, %s882_s26   ;;  %p641_p6 = scmp.lt.s32.totalorder %s886_s27, 2 }
  0x1e   : > { %p1014_p4 = por %p201_p0, %p45_p10  ;;  %s591_s17 = sshll.u32 %s272_s15, 3 }
  0x1f   : > { %s592_s18 = sshll.u32 %s886_s27, 3  ;;  %s276_s23 = scalar_lea.vmem [#allocation2], %s591_s17 }
  0x20   : > { %s280_s21 = scalar_lea.hbm %s1102_s0, %s592_s18  ;;  %s284_s28 = sshll.u32 %s276_s23, 4  ;;  %s285_s28 = int_to_ptr.vmem [resolvable:$true] %s284_s28 }
  0x21   : > { %s282_s22 = sshll.u32 %s280_s21, 4  ;;  %p1023_p8 = pnand %p641_p6, %p41_p2  ;;  %s283_s22 = int_to_ptr.hbm [resolvable:$true] %s282_s22 }
  0x22   : > { %s273_s12 = scalar_lea.sflag [#allocation3], %s272_s15  ;;  %s782_s30 = sshra.s32 %s283_s22, 4  ;;  %s783_s30 = int_to_ptr.hbm [resolvable:$true] %s782_s30 }
  0x23   : > { %s784_s1 = scalar_lea.hbm %s783_s30, 8  ;;  %p786_p9 = pneg %p1023_p8 }
  0x24   : > { %p785_p7 = scmp.ne.s32.totalorder %s783_s30, %s784_s1  ;;  %s789_s17 = scalar_lea.hbm %s1102_s0, 16 }
  0x25   : > { %p790_p0 = scmp.lt.s32.totalorder %s783_s30, %s1102_s0  ;;  %p791_p2 = scmp.lt.s32.totalorder %s789_s17, %s784_s1 }
  0x26   : > { %p787_p10 = pnand %p786_p9, %p785_p7 }
  0x27   : > { %p792_p6 = por %p791_p2, %p790_p0 }
  0x28   : > { %p788_p11 = pneg %p787_p10 }
  0x2a   : > { %p793_p5 = pnand %p792_p6, %p788_p11 }
  0x2c   : > { %796 = shalt.err (!%p793_p5)
}
  0x2d   : > { %633 = dma.hbm_to_vmem [thread:$0]  (!%p1023_p8), %s283_s22, 128, %s285_s28, %s273_s12  }
  0x2e   : > { %293 = sbr.rel (%p962_p3) target bundleno = 492 (0x1ec), region = 48  ;;  %s1040_s15 = sand.u32 (!%p962_p3), 1, %s878_s25  }
  0x2f   : > { %s594_s23 = sshll.u32 (!%p962_p3), %s1040_s15, 3  ;;  %s296_s18 = scalar_lea.sflag (!%p962_p3), [#allocation3], %s1040_s15 }
  0x30   : > { %s299_s1 = scalar_lea.vmem (!%p962_p3), [#allocation2], %s594_s23 }
  0x33   : > { %857 = dma.done.wait (%p1005_p12), %s296_s18, 128  }
  0x34   : > { %859 = vsyncadd (%p1005_p12), %s296_s18, 4294967168 }
  0x35   : > { %861 = dma.done.wait (%p46_p1), [#allocation6], 2304  }
  0x36   : > { %863 = vsyncadd (%p46_p1), [#allocation6], 4294964992 }
  0x37   : > { %865 = dma.done.wait (%p46_p1), [#allocation9], 2048  }
  0x38   : > { %867 = vsyncadd (%p46_p1), [#allocation9], 4294965248  ;;  %v348_v0 = vld [vmem:[#allocation5 + $0x8] sm:$0xff]  ;;  %v347_v1 = vld [vmem:[#allocation5] sm:$0xff]  ;;  %vm353_vm0 = vcmask 130048   ;;  %s601_s30 = sshll.u32 %s957_s8, 3 }
  0x39   : > { %371 = vmatpush.msra.mxu0 %v348_v0  ;;  %v346_v2 = vld [vmem:[%s299_s1] sm:$0xff]  ;;  %v396_v3 = vld [vmem:[#allocation7 + $0x78] sm:$0xff]  ;;  %v395_v4 = vld [vmem:[#allocation7 + $0x70] sm:$0xff]  ;;  %s481_s20 = scalar_lea.hbm %s1109_s7, %s601_s30  ;;  %s345_s21 = scalar_lea.vmem [#allocation10], %s594_s23 }
  0x3a   : > { %401 = vmatpush.msra.mxu1 %v396_v3  ;;  %v394_v5 = vld [vmem:[#allocation7 + $0x68] sm:$0xff]  ;;  %v393_v6 = vld [vmem:[#allocation7 + $0x60] sm:$0xff]  ;;  %v392_v7 = vld [vmem:[#allocation7 + $0x58] sm:$0xff]  ;;  %s483_s18 = sshll.u32 %s345_s21, 4  ;;  %s485_s1 = sshll.u32 %s481_s20, 4  ;;  %s484_s18 = int_to_ptr.vmem [resolvable:$true] %s483_s18  ;;  %s486_s1 = int_to_ptr.hbm [resolvable:$true] %s485_s1 }
  0x3b   : > { %372 = vmatpush.msra.mxu0 %v347_v1  ;;  %v391_v8 = vld [vmem:[#allocation7 + $0x50] sm:$0xff]  ;;  %v390_v9 = vld [vmem:[#allocation7 + $0x48] sm:$0xff]  ;;  %v389_v10 = vld [vmem:[#allocation7 + $0x40] sm:$0xff]  ;;  %s471_s9 = scalar_lea.sflag [#allocation4], %s1040_s15  ;;  %s826_s13 = sshra.s32 %s486_s1, 4  ;;  %s827_s13 = int_to_ptr.hbm [resolvable:$true] %s826_s13 }
  0x3c   : > { %599 = vmatmul.msk.f32.vlgmr.msra.gmra.mxu0 %vm353_vm0, %v346_v2  ;;  %402 = vmatpush.msra.mxu1 %v395_v4  ;;  %v388_v11 = vld [vmem:[#allocation7 + $0x38] sm:$0xff]  ;;  %v387_v12 = vld [vmem:[#allocation7 + $0x30] sm:$0xff]  ;;  %v386_v13 = vld [vmem:[#allocation7 + $0x28] sm:$0xff]  ;;  %s828_s22 = scalar_lea.hbm %s827_s13, 8  ;;  %s832_s29 = scalar_lea.hbm %s1109_s7, 16 }
  0x3d   : > { %v385_v14 = vld [vmem:[#allocation7 + $0x20] sm:$0xff]  ;;  %v384_v15 = vld [vmem:[#allocation7 + $0x18] sm:$0xff]  ;;  %v383_v16 = vld [vmem:[#allocation7 + $0x10] sm:$0xff]  ;;  %p829_p1 = scmp.ne.s32.totalorder %s827_s13, %s828_s22  ;;  %p833_p12 = scmp.lt.s32.totalorder %s827_s13, %s1109_s7 }
  0x3e   : > { %403 = vmatpush.msra.mxu1 %v394_v5  ;;  %v382_v17 = vld [vmem:[#allocation7 + $0x8] sm:$0xff]  ;;  %v381_v18 = vld [vmem:[#allocation7] sm:$0xff]  ;;  %v440_v19 = vld [vmem:[#allocation8 + $0x78] sm:$0xff]  ;;  %p834_p8 = scmp.lt.s32.totalorder %s832_s29, %s828_s22 }
  0x3f   : > { %v439_v20 = vld [vmem:[#allocation8 + $0x70] sm:$0xff]  ;;  %445 = vmatpush.msra.mxu2 %v440_v19  ;;  %v438_v21 = vld [vmem:[#allocation8 + $0x68] sm:$0xff]  ;;  %v437_v22 = vld [vmem:[#allocation8 + $0x60] sm:$0xff]  ;;  %p830_p3 = pnand %p829_p1, %p1009_p13 }
  0x40   : > { %404 = vmatpush.msra.mxu1 %v393_v6  ;;  %v436_v23 = vld [vmem:[#allocation8 + $0x58] sm:$0xff]  ;;  %v435_v24 = vld [vmem:[#allocation8 + $0x50] sm:$0xff]  ;;  %v434_v25 = vld [vmem:[#allocation8 + $0x48] sm:$0xff]  ;;  %p835_p7 = por %p834_p8, %p833_p12 }
  0x41   : > { %446 = vmatpush.msra.mxu2 %v439_v20  ;;  %v433_v26 = vld [vmem:[#allocation8 + $0x40] sm:$0xff]  ;;  %v432_v34 = vld [vmem:[#allocation8 + $0x38] sm:$0xff]  ;;  %v431_v35 = vld [vmem:[#allocation8 + $0x30] sm:$0xff]  ;;  %p831_p5 = pneg %p830_p3 }
  0x42   : > { %405 = vmatpush.msra.mxu1 %v392_v7  ;;  %v683_v27 = vld [vmem:[%s1104_s2] ss:$0 sm:$0xff]  ;;  %v430_v36 = vld [vmem:[#allocation8 + $0x28] sm:$0xff]  ;;  %v428_v38 = vld [vmem:[#allocation8 + $0x18] sm:$0xff] }
  0x43   : > { %447 = vmatpush.msra.mxu2 %v438_v21  ;;  %v429_v37 = vld [vmem:[#allocation8 + $0x20] sm:$0xff]  ;;  %v427_v39 = vld [vmem:[#allocation8 + $0x10] sm:$0xff]  ;;  %v426_v40 = vld [vmem:[#allocation8 + $0x8] sm:$0xff]  ;;  %p836_p9 = pnand %p835_p7, %p831_p5 }
  0x44   : > { %406 = vmatpush.msra.mxu1 %v391_v8  ;;  %v425_v41 = vld [vmem:[#allocation8] sm:$0xff] }
  0x45   : > { %448 = vmatpush.msra.mxu2 %v437_v22  ;;  %v684_v42 = vld [vmem:[%s1106_s4] ss:$0 sm:$0xff] }
  0x46   : > { %407 = vmatpush.msra.mxu1 %v390_v9  ;;  %v685_v49 = vld [vmem:[%s1108_s6] ss:$0 sm:$0xff] }
  0x47   : > { %449 = vmatpush.msra.mxu2 %v436_v23 }
  0x48   : > { %408 = vmatpush.msra.mxu1 %v389_v10 }
  0x49   : > { %450 = vmatpush.msra.mxu2 %v435_v24 }
  0x4a   : > { %409 = vmatpush.msra.mxu1 %v388_v11 }
  0x4b   : > { %451 = vmatpush.msra.mxu2 %v434_v25 }
  0x4c   : > { %410 = vmatpush.msra.mxu1 %v387_v12 }
  0x4d   : > { %452 = vmatpush.msra.mxu2 %v433_v26 }
  0x4e   : > { %411 = vmatpush.msra.mxu1 %v386_v13 }
  0x4f   : > { %453 = vmatpush.msra.mxu2 %v432_v34 }
  0x50   : > { %412 = vmatpush.msra.mxu1 %v385_v14 }
  0x51   : > { %454 = vmatpush.msra.mxu2 %v431_v35 }
  0x52   : > { %413 = vmatpush.msra.mxu1 %v384_v15 }
  0x53   : > { %455 = vmatpush.msra.mxu2 %v430_v36 }
  0x54   : > { %414 = vmatpush.msra.mxu1 %v383_v16 }
  0x55   : > { %456 = vmatpush.msra.mxu2 %v429_v37 }
  0x56   : > { %415 = vmatpush.msra.mxu1 %v382_v17 }
  0x57   : > { %457 = vmatpush.msra.mxu2 %v428_v38 }
  0x58   : > { %416 = vmatpush.msra.mxu1 %v381_v18 }
  0x59   : > { %458 = vmatpush.msra.mxu2 %v427_v39 }
  0x5b   : > { %459 = vmatpush.msra.mxu2 %v426_v40 }
  0x5d   : > { %460 = vmatpush.msra.mxu2 %v425_v41 }
  0xb9   : > { %v374_v28 = vpop.f32.mrf.mxu0 }
  0xba   : > { %v375_v29 = vadd.f32 %v683_v27, %v374_v28 }
  0xbc   : > { %v377_v30 = vmul.f32 0.5, %v375_v29 }
  0xbe   : > { %686 = vtanh.f32 %v377_v30 }
  0xc4   : > { %v687_v31 = vpop.eup %686 }
  0xc5   : > { %v379_v32 = vmul.f32 0.5, %v687_v31 }
  0xc7   : > { %v380_v33 = vadd.f32 0.5, %v379_v32 }
  0xc9   : > { %417 = vmatmul.f32.vlgmr.msra.gmra.mxu1 %v380_v33 }
 0x146   : > { %v418_v43 = vpop.f32.mrf.mxu1 }
 0x147   : > { %v419_v44 = vadd.f32 %v684_v42, %v418_v43 }
 0x149   : > { %v421_v45 = vmul.f32 0.5, %v419_v44 }
 0x14b   : > { %688 = vtanh.f32 %v421_v45 }
 0x151   : > { %v689_v46 = vpop.eup %688 }
 0x152   : > { %v423_v47 = vmul.f32 0.5, %v689_v46 }
 0x154   : > { %v424_v48 = vadd.f32 0.5, %v423_v47 }
 0x156   : > { %461 = vmatmul.f32.vlgmr.msra.gmra.mxu2 %v424_v48 }
 0x1d9   : > { %v462_v50 = vpop.f32.mrf.mxu2 }
 0x1da   : > { %v463_v51 = vadd.f32 %v685_v49, %v462_v50 }
 0x1dc   : > { %v465_v52 = vmul.f32 0.5, %v463_v51 }
 0x1de   : > { %690 = vtanh.f32 %v465_v52 }
 0x1e4   : > { %v691_v53 = vpop.eup %690 }
 0x1e5   : > { %v467_v54 = vmul.f32 0.5, %v691_v53 }
 0x1e7   : > { %v468_v55 = vadd.f32 0.5, %v467_v54 }
 0x1e9   : > { %469 = vst [vmem:[%s345_s21] sm:$0xff] %v468_v55 }
 0x1ea   : > { %839 = shalt.err (!%p836_p9)
}
 0x1eb   : > { %618 = dma.vmem_to_hbm [thread:$0]  (%p1009_p13), %s484_s18, 128, %s486_s1, %s471_s9  }
 0x1ec PF: > { %s497_s15 = sand.u32 1, %s874_s24   ;;  %p1118_p10 = scmp.ge.s32.totalorder %s886_s27, 2 }
 0x1ed   : > { %s498_s30 = scalar_lea.sflag [#allocation4], %s497_s15 }
 0x1ee   : > { %p635_p11 = pnand %p1118_p10, %p1014_p4 }
 0x1f0   : > { %p636_p0 = pneg %p635_p11 }
 0x1f2   : > { %869 = dma.done.wait (%p636_p0), %s498_s30, 128  }
 0x1f3   : > { %871 = vsyncadd (%p636_p0), %s498_s30, 4294967168  ;;  %p22_p2 = scmp.ge.s32.totalorder %s989_s10, 4   ;;  %s1119_s24 = smov %s878_s25 }
 0x1f4   : > { %s1120_s25 = smov %s882_s26  ;;  %s1121_s26 = smov %s1001_s11 }
 0x1f5   : > { %s1122_s27 = smov %s989_s10  ;;  %24 = sbr.rel (!%p22_p2) target bundleno = 9 (0x9), region = 105 }
 0x1fa   :  { %504 = vsyncpa [#allocation3], 1 }
 0x1fb   :  { %506 = vsyncpa [#allocation3 + $0x1], 1 }
 0x1fc   :  { %507 = vsyncpa [#allocation6], 1 }
 0x1fd   :  { %508 = vsyncpa [#allocation9], 1 }
 0x1fe   :  { %509 = vsyncpa [#allocation4], 1 }
 0x1ff   :  { %511 = vsyncpa [#allocation4 + $0x1], 1 }

</bundles_post_ra>
